<compile_context>
chip_gen: v6e
topology: v6e:2x2x1
jax: 0.10.0
libtpu: 0.0.40
codegen_flags: <defaults>
</compile_context>

<pallas_src>
import functools

import jax
import jax.numpy as jnp
import numpy as np
from jax.experimental import pallas as pl
from jax.experimental.pallas import tpu as pltpu


def _round_up(x, m):
    return (x + m - 1) // m * m


def _tpu_vmem_capacity_bytes():
    """Per-TensorCore VMEM capacity; conservative fallback if undetectable."""
    try:
        return int(pltpu.get_tpu_info().vmem_capacity_bytes)
    except Exception:
        return 64 << 20  # v7x-sized: a safe lower bound on every generation


def _direct_norm_loss_kernel(labels_ref, s_ref, t_ref, ctab_ref, out_ref, acc_ref, *,
                             n_valid, tile_n, tiles_per_core, first_pad_tile,
                             needs_mask, flip_gather, has_core_axis):
    if has_core_axis:
        core = pl.program_id(0)
        step = pl.program_id(1)
    else:
        core = 0
        step = pl.program_id(0)

    @pl.when(step == 0)
    def _():
        acc_ref[...] = jnp.zeros_like(acc_ref)

    s = s_ref[...].astype(jnp.float32)          # (tile_n, D)
    t = t_ref[...].astype(jnp.float32)          # (tile_n, D)
    labels = labels_ref[...]                    # (tile_n, 1) int32

    if flip_gather:
        # ctab_ref is the pre-normalized table transposed to (D, C_pad):
        # lane-dense MXU output, no materialized (tile_n, D) gathered centers.
        scores = jnp.dot(s, ctab_ref[...], preferred_element_type=jnp.float32)
        class_ids = jax.lax.broadcasted_iota(jnp.int32, scores.shape, 1)
        one_hot = (class_ids == labels).astype(jnp.float32)
        dots = jnp.sum(scores * one_hot, axis=-1, keepdims=True)
    else:
        # ctab_ref is (C_pad, D), pre-normalized: classic one-hot MXU gather.
        c_pad = ctab_ref.shape[0]
        class_ids = jax.lax.broadcasted_iota(jnp.int32, (tile_n, c_pad), 1)
        one_hot = (class_ids == labels).astype(jnp.float32)
        c = jnp.dot(one_hot, ctab_ref[...], preferred_element_type=jnp.float32)
        dots = jnp.sum(s * c, axis=-1, keepdims=True)

    s_sq = jnp.sum(s * s, axis=-1, keepdims=True)
    t_sq = jnp.sum(t * t, axis=-1, keepdims=True)
    max_sq = jnp.maximum(s_sq, t_sq)

    if needs_mask:
        tile_idx = core * tiles_per_core + step

        @pl.when(tile_idx >= first_pad_tile)          # only tiles that can hold padding
        def _():
            row = jax.lax.broadcasted_iota(jnp.int32, (tile_n, 1), 0)
            global_row = tile_idx * tile_n + row
            valid = global_row < n_valid
            safe_sq = jnp.where(valid, max_sq, jnp.float32(1.0))
            contrib = jnp.where(valid, dots * jax.lax.rsqrt(safe_sq), jnp.float32(0.0))
            acc_ref[...] = acc_ref[...] + contrib

        @pl.when(tile_idx < first_pad_tile)           # unmasked fast path
        def _():
            acc_ref[...] = acc_ref[...] + dots * jax.lax.rsqrt(max_sq)
    else:
        acc_ref[...] = acc_ref[...] + dots * jax.lax.rsqrt(max_sq)

    # Epilogue: single cross-sublane reduce + SMEM scalar write per core.
    @pl.when(step == tiles_per_core - 1)
    def _():
        out_ref[0, 0] = jnp.sum(acc_ref[...])


def direct_norm_loss(s_emb, t_emb, center_table, labels, nd_weight=1.0,
                     tile_n_max=4096, num_cores=1, eps=1e-12):
    """JAX/Pallas equivalent of DirectNormLoss.forward.

    Args:
      s_emb:        (N, D) student embeddings (any float dtype; streamed native).
      t_emb:        (N, D) teacher embeddings.
      center_table: (num_class, D) class-center embeddings (stand-in for T_EMB).
      labels:       (N,) integer class ids.
      nd_weight:    scalar loss weight.
      num_cores:    1 on single-TC chips (v5e/v6e); 2 on v7x to use both TCs.
    Returns:
      scalar f32 loss.
    """
    assert s_emb.shape == t_emb.shape
    n, d = s_emb.shape
    assert labels.shape[0] == n
    num_class, d_c = center_table.shape
    assert d_c == d

    in_itemsize = jnp.dtype(s_emb.dtype).itemsize

    # --- pre-normalize the class-center table once, in f32, in the wrapper ---
    ctab = center_table.astype(jnp.float32)
    c_sq = jnp.sum(ctab * ctab, axis=-1, keepdims=True)
    c_hat = ctab / jnp.sqrt(jnp.maximum(c_sq, jnp.float32(eps)))

    c_pad = _round_up(num_class, 128)
    if c_pad != num_class:
        c_hat = jnp.pad(c_hat, ((0, c_pad - num_class), (0, 0)))

    # Flipped gather (s @ c_hat^T) gives a lane-dense MXU output when D < 128
    # or when there are more (padded) classes than embedding dims.
    flip_gather = (d < 128) or (c_pad > d)
    # TODO(synk): for num_class in the thousands, replace the O(N*C*D) one-hot
    # contraction with a real gather (scalar-prefetched labels + per-row DMA).
    if flip_gather:
        table = c_hat.T                      # (D, C_pad), transposed once in XLA
        table_rows, table_cols = d, c_pad
    else:
        table = c_hat                        # (C_pad, D)
        table_rows, table_cols = c_pad, d

    d_lane = _round_up(d, 128)
    table_bytes_single = _round_up(table_rows, 8) * _round_up(table_cols, 128) * 4
    single_buffer_table = table_bytes_single >= (1 << 20)   # only worth it when big
    table_bytes = (1 if single_buffer_table else 2) * table_bytes_single

    # --- generation-aware VMEM budget (v5e/v6e: 128 MiB, v7x: 64 MiB per TC) ---
    vmem_cap = _tpu_vmem_capacity_bytes()
    if vmem_cap >= (96 << 20):
        stream_budget, vmem_ceiling = 64 << 20, 96 << 20
    else:
        stream_budget, vmem_ceiling = 40 << 20, 56 << 20

    # Per-row VMEM: double-buffered s/t/labels streams (native dtype, lane-
    # padded), f32 casts, (tile_n, C_pad) scores/one_hot temporaries, and the
    # (tile_n, 1) accumulator / per-row statistics (all lane-padded to 128).
    per_row = 2 * (2 * d_lane * in_itemsize)       # s + t, 2 pipeline buffers
    per_row += 2 * (128 * 4)                       # labels tile, 2 buffers
    per_row += 2 * d_lane * 4                      # f32 casts of s, t
    per_row += 3 * c_pad * 4                       # scores / one_hot / product
    per_row += 8 * 128 * 4                         # acc + (tile_n,1) row vectors

    cap_rows = max(8, (stream_budget - table_bytes - (4 << 20)) // per_row)
    tile_n = max(8, (min(tile_n_max, cap_rows) // 8) * 8)
    tile_n = min(tile_n, _round_up(n, 8))

    n_tiles = -(-n // tile_n)
    n_tiles_pad = _round_up(n_tiles, num_cores)
    tiles_per_core = n_tiles_pad // num_cores
    n_pad = n_tiles_pad * tile_n

    if n_pad != n:
        pad = n_pad - n
        s_emb = jnp.pad(s_emb, ((0, pad), (0, 0)))
        t_emb = jnp.pad(t_emb, ((0, pad), (0, 0)))
        labels = jnp.pad(labels, (0, pad))
    labels2d = labels.astype(jnp.int32).reshape(n_pad, 1)

    vmem_est = tile_n * per_row + table_bytes + (2 << 20)
    vmem_limit = int(min(max(vmem_est, 16 << 20), vmem_ceiling))

    cost = pl.CostEstimate(
        flops=int(n_pad * (2 * c_pad * d + 8 * d + 2 * c_pad)),
        transcendentals=int(n_pad),
        bytes_accessed=int(2 * n_pad * d * in_itemsize + n_pad * 4
                           + table_rows * table_cols * 4 + num_cores * 4),
    )

    kernel = functools.partial(
        _direct_norm_loss_kernel,
        n_valid=n, tile_n=tile_n, tiles_per_core=tiles_per_core,
        first_pad_tile=n // tile_n, needs_mask=(n_pad != n),
        flip_gather=flip_gather, has_core_axis=(num_cores > 1))

    table_spec_kwargs = {}
    if single_buffer_table:
        # Resident table (constant index_map): double-buffering only wastes VMEM.
        table_spec_kwargs["pipeline_mode"] = pl.Buffered(1)

    if num_cores > 1:
        grid = (num_cores, tiles_per_core)
        row_map = lambda c, i: (c * tiles_per_core + i, 0)
        tab_map = lambda c, i: (0, 0)
        out_map = lambda c, i: (c, 0)
        semantics = ("parallel", "arbitrary")
    else:
        grid = (tiles_per_core,)
        row_map = lambda i: (i, 0)
        tab_map = lambda i: (0, 0)
        out_map = lambda i: (0, 0)
        semantics = ("arbitrary",)

    partials = pl.pallas_call(
        kernel,
        out_shape=jax.ShapeDtypeStruct((num_cores, 1), jnp.float32),
        grid=grid,
        in_specs=[
            pl.BlockSpec((tile_n, 1), row_map),                      # labels tile
            pl.BlockSpec((tile_n, d), row_map),                      # student tile
            pl.BlockSpec((tile_n, d), row_map),                      # teacher tile
            pl.BlockSpec((table_rows, table_cols), tab_map,
                         **table_spec_kwargs),                       # resident centers
        ],
        out_specs=pl.BlockSpec((1, 1), out_map, memory_space=pltpu.SMEM),
        scratch_shapes=[pltpu.VMEM((tile_n, 1), jnp.float32)],
        compiler_params=pltpu.CompilerParams(
            dimension_semantics=semantics,
            vmem_limit_bytes=vmem_limit,
        ),
        cost_estimate=cost,
    )(labels2d, s_emb, t_emb, table)

    total = jnp.sum(partials)
    # sum_i (1 - dot(s_i, c_hat_i)/max(||s_i||,||t_i||)) == N - total; * nd_weight / N
    return nd_weight * (n - total) / n


def _numpy_reference(s_np, t_np, c_np, l_np, nd_weight):
    ref = 0.0
    for i in range(s_np.shape[0]):
        c = c_np[l_np[i]]
        e_c = c / np.linalg.norm(c)
        max_norm = max(np.linalg.norm(s_np[i]), np.linalg.norm(t_np[i]))
        ref += 1.0 - np.dot(s_np[i], e_c) / max_norm
    return ref * nd_weight / s_np.shape[0]


if __name__ == "__main__":
    NUM_CLASS = 81   # matches default num_class=81
    ND_WEIGHT = 1.0
    D = 32

    key = jax.random.PRNGKey(0)
    k_s, k_t, k_c, k_l = jax.random.split(key, 4)
    center_table = jax.random.normal(k_c, (NUM_CLASS, D), dtype=jnp.float32)

    # --- Case 1: small batch, single tile, no padding ---
    N1 = 8
    s1 = jax.random.normal(k_s, (N1, D), dtype=jnp.float32)
    t1 = jax.random.normal(k_t, (N1, D), dtype=jnp.float32)
    l1 = jax.random.randint(k_l, (N1,), 0, NUM_CLASS, dtype=jnp.int32)
    loss1 = jax.block_until_ready(
        direct_norm_loss(s1, t1, center_table, l1, nd_weight=ND_WEIGHT))
    ref1 = _numpy_reference(np.asarray(s1), np.asarray(t1),
                            np.asarray(center_table), np.asarray(l1), ND_WEIGHT)
    np.testing.assert_allclose(np.asarray(loss1), ref1, rtol=1e-5, atol=1e-5)

    # --- Case 2: multi-tile + padding + 2-wide core axis (masked epilogue path) ---
    N2 = 20
    k_s2, k_t2, k_l2 = jax.random.split(jax.random.PRNGKey(1), 3)
    s2 = jax.random.normal(k_s2, (N2, D), dtype=jnp.float32)
    t2 = jax.random.normal(k_t2, (N2, D), dtype=jnp.float32)
    l2 = jax.random.randint(k_l2, (N2,), 0, NUM_CLASS, dtype=jnp.int32)
    loss2 = jax.block_until_ready(
        direct_norm_loss(s2, t2, center_table, l2, nd_weight=ND_WEIGHT,
                         tile_n_max=8, num_cores=2))
    ref2 = _numpy_reference(np.asarray(s2), np.asarray(t2),
                            np.asarray(center_table), np.asarray(l2), ND_WEIGHT)
    np.testing.assert_allclose(np.asarray(loss2), ref2, rtol=1e-5, atol=1e-5)

    print("KERNEL_OK")
</pallas_src>

<mosaic_0001>
module attributes {stable_mosaic.version = 11 : i64} {
  func.func @_direct_norm_loss_kernel(%arg0: i32, %arg1: memref<8x1xi32, #tpu.memory_space<vmem>>, %arg2: memref<8x32xf32, #tpu.memory_space<vmem>>, %arg3: memref<8x32xf32, #tpu.memory_space<vmem>>, %arg4: memref<32x128xf32, #tpu.memory_space<vmem>>, %arg5: memref<1x1xf32, #tpu.memory_space<smem>>, %arg6: memref<8x1xf32, #tpu.memory_space<vmem>>) attributes {dimension_semantics = [#tpu.dimension_semantics<arbitrary>], iteration_bounds = array<i64: 1>, scalar_prefetch = 0 : i64, scratch_operands = 1 : i64, tpu.core_type = #tpu.core_type<tc>, window_params = [{transform_indices = @transform_0, window_bounds = array<i64: 8, 1>}, {transform_indices = @transform_1, window_bounds = array<i64: 8, 32>}, {transform_indices = @transform_2, window_bounds = array<i64: 8, 32>}, {pipeline_mode = #tpu.pipeline_mode<synchronous>, transform_indices = @transform_3, window_bounds = array<i64: 32, 128>}, {transform_indices = @transform_4, window_bounds = array<i64: 1, 1>}]} {
    %c0_i32 = arith.constant 0 : i32
    %0 = arith.cmpi eq, %arg0, %c0_i32 : i32
    %1 = arith.extui %0 : i1 to i32
    %c0_i32_0 = arith.constant 0 : i32
    %2 = arith.cmpi ne, %1, %c0_i32_0 : i32
    scf.if %2 {
      %cst_17 = arith.constant 0.000000e+00 : f32
      %31 = vector.broadcast %cst_17 : f32 to vector<8x1xf32>
      %c0_18 = arith.constant 0 : index
      %c0_19 = arith.constant 0 : index
      %32 = vector.load %arg6[%c0_18, %c0_19] : memref<8x1xf32, #tpu.memory_space<vmem>>, vector<8x1xf32>
      tpu.vector_store %arg6[%c0_18, %c0_19], %31 {strides = array<i32>} : memref<8x1xf32, #tpu.memory_space<vmem>>, vector<8x1xf32>,
    } else {
    }
    %c0 = arith.constant 0 : index
    %c0_1 = arith.constant 0 : index
    %3 = vector.load %arg2[%c0, %c0_1] : memref<8x32xf32, #tpu.memory_space<vmem>>, vector<8x32xf32>
    %c0_2 = arith.constant 0 : index
    %c0_3 = arith.constant 0 : index
    %4 = vector.load %arg3[%c0_2, %c0_3] : memref<8x32xf32, #tpu.memory_space<vmem>>, vector<8x32xf32>
    %c0_4 = arith.constant 0 : index
    %c0_5 = arith.constant 0 : index
    %5 = vector.load %arg1[%c0_4, %c0_5] : memref<8x1xi32, #tpu.memory_space<vmem>>, vector<8x1xi32>
    %c0_6 = arith.constant 0 : index
    %c0_7 = arith.constant 0 : index
    %6 = vector.load %arg4[%c0_6, %c0_7] : memref<32x128xf32, #tpu.memory_space<vmem>>, vector<32x128xf32>
    %cst = arith.constant dense<0.000000e+00> : vector<8x128xf32>
    %7 = tpu.matmul %3, %6, %cst {dimension_numbers = #tpu.dot_dimension_numbers<[1], [0], [0], [1], [0, 0, 1, 1], [], []>} : vector<8x32xf32>, vector<32x128xf32>, vector<8x128xf32> -> vector<8x128xf32>
    %8 = tpu.iota {dimensions = array<i32: 1>} : vector<8x128xi32>
    %9 = vector.broadcast %5 : vector<8x1xi32> to vector<8x128xi32>
    %10 = arith.cmpi eq, %8, %9 : vector<8x128xi32>
    %11 = arith.extui %10 : vector<8x128xi1> to vector<8x128xi32>
    %12 = arith.sitofp %11 : vector<8x128xi32> to vector<8x128xf32>
    %13 = arith.mulf %7, %12 : vector<8x128xf32>
    %cst_8 = arith.constant dense<0.000000e+00> : vector<8xf32>
    %14 = vector.multi_reduction <add>, %13, %cst_8 [1] : vector<8x128xf32> to vector<8xf32>
    %15 = vector.shape_cast %14 : vector<8xf32> to vector<8x1xf32>
    %16 = arith.mulf %3, %3 : vector<8x32xf32>
    %cst_9 = arith.constant dense<0.000000e+00> : vector<8xf32>
    %17 = vector.multi_reduction <add>, %16, %cst_9 [1] : vector<8x32xf32> to vector<8xf32>
    %18 = vector.shape_cast %17 : vector<8xf32> to vector<8x1xf32>
    %19 = arith.mulf %4, %4 : vector<8x32xf32>
    %cst_10 = arith.constant dense<0.000000e+00> : vector<8xf32>
    %20 = vector.multi_reduction <add>, %19, %cst_10 [1] : vector<8x32xf32> to vector<8xf32>
    %21 = vector.shape_cast %20 : vector<8xf32> to vector<8x1xf32>
    %22 = arith.maximumf %18, %21 : vector<8x1xf32>
    %c0_11 = arith.constant 0 : index
    %c0_12 = arith.constant 0 : index
    %23 = vector.load %arg6[%c0_11, %c0_12] : memref<8x1xf32, #tpu.memory_space<vmem>>, vector<8x1xf32>
    %24 = math.rsqrt %22 : vector<8x1xf32>
    %25 = arith.mulf %15, %24 : vector<8x1xf32>
    %26 = arith.addf %23, %25 : vector<8x1xf32>
    %c0_13 = arith.constant 0 : index
    %c0_14 = arith.constant 0 : index
    %27 = vector.load %arg6[%c0_13, %c0_14] : memref<8x1xf32, #tpu.memory_space<vmem>>, vector<8x1xf32>
    tpu.vector_store %arg6[%c0_13, %c0_14], %26 {strides = array<i32>} : memref<8x1xf32, #tpu.memory_space<vmem>>, vector<8x1xf32>,
    %c0_i32_15 = arith.constant 0 : i32
    %28 = arith.cmpi eq, %arg0, %c0_i32_15 : i32
    %29 = arith.extui %28 : i1 to i32
    %c0_i32_16 = arith.constant 0 : i32
    %30 = arith.cmpi ne, %29, %c0_i32_16 : i32
    scf.if %30 {
      %c0_17 = arith.constant 0 : index
      %c0_18 = arith.constant 0 : index
      %31 = vector.load %arg6[%c0_17, %c0_18] : memref<8x1xf32, #tpu.memory_space<vmem>>, vector<8x1xf32>
      %32 = vector.shape_cast %31 : vector<8x1xf32> to vector<1x8x1xf32>
      %cst_19 = arith.constant dense<0.000000e+00> : vector<1xf32>
      %33 = vector.multi_reduction <add>, %32, %cst_19 [1, 2] : vector<1x8x1xf32> to vector<1xf32>
      %34 = vector.shape_cast %33 : vector<1xf32> to vector<1x1x1xf32>
      %35 = vector.extract %34[0, 0, 0] : f32 from vector<1x1x1xf32>
      %c0_20 = arith.constant 0 : index
      %c0_21 = arith.constant 0 : index
      %36 = memref.load %arg5[%c0_20, %c0_21] : memref<1x1xf32, #tpu.memory_space<smem>>
      memref.store %35, %arg5[%c0_20, %c0_21] : memref<1x1xf32, #tpu.memory_space<smem>>
    } else {
    }
    return
  }
  func.func @transform_0(%arg0: i32) -> (i32, i32) {
    %c0_i32 = arith.constant 0 : i32
    %c0_i32_0 = arith.constant 0 : i32
    return %arg0, %c0_i32 : i32, i32
  }
  func.func @transform_1(%arg0: i32) -> (i32, i32) {
    %c0_i32 = arith.constant 0 : i32
    %c0_i32_0 = arith.constant 0 : i32
    return %arg0, %c0_i32 : i32, i32
  }
  func.func @transform_2(%arg0: i32) -> (i32, i32) {
    %c0_i32 = arith.constant 0 : i32
    %c0_i32_0 = arith.constant 0 : i32
    return %arg0, %c0_i32 : i32, i32
  }
  func.func @transform_3(%arg0: i32) -> (i32, i32) {
    %c0_i32 = arith.constant 0 : i32
    %c0_i32_0 = arith.constant 0 : i32
    %c0_i32_1 = arith.constant 0 : i32
    return %c0_i32, %c0_i32_0 : i32, i32
  }
  func.func @transform_4(%arg0: i32) -> (i32, i32) {
    %c0_i32 = arith.constant 0 : i32
    %c0_i32_0 = arith.constant 0 : i32
    %c0_i32_1 = arith.constant 0 : i32
    return %c0_i32, %c0_i32_0 : i32, i32
  }
}

</mosaic_0001>

<bundles_post_ra>
// kernel: tpu_custom_call.1
= control target key start
LH: loop header
LB: loop body
LE: loop exit
PB: predicated region body
PF: predicated region fallthrough
CT: control target
= control target key end

     0   :  { %9 = vsyncpa [#allocation4], 0  ;;  %s324_s0 = inlined_call_operand.vmem [shape: s32[8,1], index: 0, kind: input, shape index: {}]   ;;  %s325_s1 = inlined_call_operand.vmem [shape: f32[8,32], index: 1, kind: input, shape index: {}]   ;;  %s326_s2 = inlined_call_operand.hbm [shape: f32[8,32], index: 2, kind: input, shape index: {}]   ;;  %s327_s3 = inlined_call_operand.hbm [shape: f32[32,128], index: 3, kind: input, shape index: {}]   ;;  %s328_s4 = inlined_call_operand.hbm [shape: f32[1,1], index: 4, kind: output, shape index: {}]  }
   0x1   :  { %10 = vsyncpa [#allocation7], 0 }
   0x2   :  { %11 = vsyncpa [#allocation5], 0  ;;  %s273_s15 = smov [#allocation3]   ;;  %s274_s17 = smov [#allocation6]  }
   0x3   :  { %s22_s16 = sshll.u32 %s273_s15, 4  ;;  %s31_s18 = sshll.u32 %s274_s17, 4  ;;  %s23_s16 = int_to_ptr.vmem [resolvable:$true] %s22_s16  ;;  %s32_s18 = int_to_ptr.vmem [resolvable:$true] %s31_s18 }
   0x4   :  { %s227_s19 = scalar_lea.vmem %s23_s16, 128  ;;  %p232_p1 = scmp.lt.s32.totalorder %s23_s16, %s23_s16 }
   0x5   :  { %p228_p0 = scmp.ne.s32.totalorder %s23_s16, %s227_s19  ;;  %p233_p2 = scmp.lt.s32.totalorder %s227_s19, %s227_s19 }
   0x7   :  { %p234_p3 = por %p233_p2, %p232_p1 }
   0x9   :  { %p235_p4 = pnand %p234_p3, %p228_p0 }
   0xb   :  { %238 = shalt.err (!%p235_p4)
}
   0xc   :  { %25 = dma.hbm_to_vmem [thread:$0]  %s326_s2, 128, %s23_s16, [#allocation4]  }
   0xd   :  { %s247_s22 = scalar_lea.vmem %s32_s18, 512  ;;  %p252_p6 = scmp.lt.s32.totalorder %s32_s18, %s32_s18 }
   0xe   :  { %p248_p5 = scmp.ne.s32.totalorder %s32_s18, %s247_s22  ;;  %p253_p7 = scmp.lt.s32.totalorder %s247_s22, %s247_s22 }
  0x10   :  { %p254_p8 = por %p253_p7, %p252_p6 }
  0x12   :  { %p255_p9 = pnand %p254_p8, %p248_p5 }
  0x14   :  { %258 = shalt.err (!%p255_p9)
}
  0x15   :  { %s275_s23 = smov 128   ;;  %s276_s24 = smov 8  }
  0x16   :  { %37 = dma.hbm_to_vmem [thread:$0]  %s327_s3, 512, %s32_s18, [#allocation7], %s275_s23, %s275_s23, %s276_s24  }
  0x17   :  { %267 = dma.done.wait [#allocation4], 128  }
  0x18   :  { %268 = vsyncadd [#allocation4], 4294967168 }
  0x19   :  { %269 = dma.done.wait [#allocation7], 512  }
  0x1a   :  { %270 = vsyncadd [#allocation7], 4294966784  ;;  %v277_v0 = vmov 0.0   ;;  %vm278_vm0 = vmmov 0   ;;  %v279_v1 = vmov 0   ;;  %v56_v2 = vld [vmem:[#allocation6 + $0x18] sm:$0xff]  ;;  %v131_v13 = vlaneseq }
  0x1b   :  { %195 = vmatprep.subr.mxu0 %v277_v0  ;;  %203 = vmatprep.mubr.msk.f32.mxu0 %vm278_vm0, %v277_v0  ;;  %v55_v3 = vld [vmem:[#allocation6 + $0x10] sm:$0xff]  ;;  %v54_v5 = vld [vmem:[#allocation6 + $0x8] sm:$0xff]  ;;  %v51_v6 = vld [vmem:[#allocation3] sm:$0xff]  ;;  %vm57_vm1 = vcmask 261120   ;;  %vm48_vm2 = vcmask 7168  }
  0x1c   :  { %216 = vset.pattern.permute.xlu0 %v279_v1  ;;  %196 = vmatpush3.msra.mxu0 %v56_v2  ;;  %v52_v4 = vld [vmem:[%s324_s0] sm:$0xff]  ;;  %v146_v7 = vmul.f32 %v51_v6, %v51_v6  ;;  %v53_v8 = vld [vmem:[#allocation6] sm:$0xff]  ;;  %49 = vst.msk [vmem:[#allocation2] sm:$0xff] %vm48_vm2, %v277_v0  ;;  %v132_v14 = vand.u32 127, %v131_v13 }
  0x1d   :  { %197 = vmatprep.subr.mxu0 %v277_v0  ;;  %134 = vperm.xlu0 %216, %v52_v4   ;;  %v50_v9 = vld [vmem:[%s325_s1] sm:$0xff]  ;;  %s280_s1 = smov [#allocation8]  }
  0x1e   :  { %198 = vmatpush3.msra.mxu0 %v55_v3  ;;  %v147_v10 = vsel %vm57_vm1, %v146_v7, 0.0  ;;  %v142_v11 = vmul.f32 %v50_v9, %v50_v9 }
  0x1f   :  { %199 = vmatprep.subr.mxu0 %v277_v0  ;;  %148 = vadd.xlane.f32.xlu1 %v147_v10 }
  0x20   :  { %200 = vmatpush3.msra.mxu0 %v54_v5  ;;  %v143_v12 = vsel %vm57_vm1, %v142_v11, 0.0 }
  0x21   :  { %201 = vmatprep.subr.mxu0 %v277_v0 }
  0x22   :  { %202 = vmatpush3.msra.mxu0 %v53_v8 }
  0x23   :  { %204 = vmatmul.mubr.msk.f32.vlgmr.msra.gmra.mxu0 %vm57_vm1, %v50_v9  ;;  %v151_v25 = vld [vmem:[#allocation2] sm:$0xff] }
  0x3c   :  { %144 = vadd.xlane.f32.xlu0 %v143_v12 }
  0x98   :  { %v135_v15 = vpop.permute.xlu0 %134 }
  0x99   :  { %vm136_vm3 = vcmp.eq.s32.totalorder %v132_v14, %v135_v15 }
  0x9a   :  { %v189_v16 = vsel %vm136_vm3, 1.0, %v277_v0 }
  0xa8   :  { %v149_v20 = vpop.xlane.xlu1 %148 }
  0xc5   :  { %v145_v21 = vpop.xlane.xlu0 %144 }
  0xc6   :  { %v150_v22 = vmax.f32 %v145_v21, %v149_v20 }
  0xc8   :  { %217 = vrsqrt.f32 %v150_v22 }
  0xd5   :  { %v218_v23 = vpop.eup %217 }
  0xe3   :  { %v127_v17 = vpop.f32.mrf.mxu0 }
  0xe4   :  { %v139_v18 = vmul.f32 %v189_v16, %v127_v17 }
  0xe5   :  { %v205_v19 = vpop.f32.mrf.mxu0 }
  0xe6   :  { %140 = vadd.xlane.f32.xlu1 %v139_v18 }
 0x16f   :  { %v141_v24 = vpop.xlane.xlu1 %140 }
 0x170   :  { %v153_v26 = vmul.f32 %v218_v23, %v141_v24 }
 0x172   :  { %v154_v27 = vadd.f32 %v153_v26, %v151_v25 }
 0x174   :  { %156 = vst.msk [vmem:[#allocation2] sm:$0xff] %vm48_vm2, %v154_v27 }
 0x17b   :  { %v160_v28 = vld [vmem:[#allocation2] sm:$0xff] }
 0x17c   :  { %v161_v29 = vsel %vm48_vm2, %v160_v28, 0.0 }
 0x17d   :  { %162 = vadd.xlane.f32.xlu1 %v161_v29 }
 0x206   :  { %v163_v30 = vpop.xlane.xlu1 %162 }
 0x207   :  { %v164_v31 = vrot.slane %v163_v30, 4 }
 0x209   :  { %v165_v32 = vadd.f32 %v164_v31, %v163_v30 }
 0x20b   :  { %v166_v33 = vrot.slane %v165_v32, 2 }
 0x20d   :  { %v167_v34 = vadd.f32 %v166_v33, %v165_v32 }
 0x20f   :  { %v168_v35 = vrot.slane %v167_v34, 1 }
 0x211   :  { %v169_v36 = vadd.f32 %v168_v35, %v167_v34 }
 0x213   :  { %206 = vpush %v169_v36 }
 0x244   :  { %s207_s0 = spop %206 }
 0x245   :  { %172 = sst [smem:[#allocation8]] %s207_s0 }
 0x246   :  { %180 = dma.smem_to_hbm %s280_s1, 16, %s328_s4, [#allocation5]  }
 0x247   :  { %271 = dma.done.wait [#allocation5], 16  }
 0x248   :  { %272 = vsyncadd [#allocation5], 4294967280 }
 0x249   :  { %184 = sfence }
 0x24a   :  { %185 = vsyncpa [#allocation4], 1 }
 0x24b   :  { %186 = vsyncpa [#allocation7], 1 }
 0x24c   :  { %187 = vsyncpa [#allocation5], 1 }

</bundles_post_ra>
